<compile_context>
chip_gen: v6e
topology: v6e:2x2x1
jax: 0.10.0
libtpu: 0.0.40
codegen_flags: <defaults>
</compile_context>

<pallas_src>
import jax
import jax.numpy as jnp
from jax.experimental import pallas as pl
from jax.experimental.pallas import tpu as pltpu


# ----------------------------------------------------------------------------
# Fused kernel: K-tap conv matmuls + bias + ReLU + fc scale + per-batch pool
# ----------------------------------------------------------------------------
def _cnn_fused_kernel(x_ref, w_ref, bconv_ref, fcw_ref, o_ref):
    # x_ref    : (TB, T + 2*pad, D)  bf16, halo'd input block for this batch tile
    # w_ref    : (K, D, F_pad)       bf16, conv weight taps (VMEM-resident)
    # bconv_ref: (1, F_pad)          f32,  conv bias (zero in padded lanes)
    # fcw_ref  : (T, F_pad)          f32,  fc weight in (t, f) layout (zero pad)
    # o_ref    : (TB, F_pad)         f32,  lane-dense per-batch partial sums
    tb = x_ref.shape[0]
    d = x_ref.shape[2]
    k_taps = w_ref.shape[0]
    t = fcw_ref.shape[0]
    f_pad = fcw_ref.shape[1]

    x = x_ref[...]                                            # (TB, T+2p, D) bf16

    # Conv1d == K accumulated MXU matmuls over shifted views of the halo block.
    acc = jnp.dot(x[:, 0:t, :].reshape(tb * t, d), w_ref[0],
                  preferred_element_type=jnp.float32)         # (TB*T, F_pad) f32
    for k in range(1, k_taps):                                # static unroll, K tiny
        acc = acc + jnp.dot(x[:, k:k + t, :].reshape(tb * t, d), w_ref[k],
                            preferred_element_type=jnp.float32)

    act = jnp.maximum(acc + bconv_ref[...], 0.0)              # bias + ReLU (VPU, f32)
    # Dropout(p=0.0) is the identity.

    # Linear head: out[b] = sum_{t,f} act[b,t,f] * fc_w[f*T + t]  (+ bias in wrapper)
    act3 = act.reshape(tb, t, f_pad)
    scaled = act3 * fcw_ref[...]                              # (T,F) broadcast over batch
    o_ref[...] = jnp.sum(scaled, axis=1)                      # (TB, F_pad) partial


# ----------------------------------------------------------------------------
# Wrapper: layout plumbing + single tiled pallas_call
# ----------------------------------------------------------------------------
def _pick_batch_tile(batch, seq_len, target_rows=1024):
    """Largest batch tile that divides B, keeps the MXU M dim (TB*T) near
    target_rows, and is either a multiple of 8 (sublane-aligned block) or the
    whole batch (block == full dim is always legal)."""
    cap = max(1, target_rows // max(seq_len, 1))
    cands = [d for d in range(1, batch + 1)
             if batch % d == 0 and (d % 8 == 0 or d == batch)]
    ok = [d for d in cands if d <= cap]
    return max(ok) if ok else min(cands)


def cnn_forward(x, params):
    """x: (B, T, D), exactly like the PyTorch module's input.  Returns (B, 1)."""
    B, T, D = x.shape
    conv_w = params["conv_w"]                  # (F, D, K)   PyTorch Conv1d layout
    conv_b = params["conv_b"]                  # (F,)
    fc_w = params["fc_w"]                      # (1, F*T)
    fc_b = params["fc_b"]                      # (1,)
    F, _, K = conv_w.shape
    pad = (K - 1) // 2
    # TODO(synk): even kernel_size gives asymmetric PyTorch padding and a shorter
    # conv output (the module's fc then mismatches); odd K is assumed here.

    F_pad = ((F + 127) // 128) * 128           # lane-dense matmul N / lane dim

    # Halo'd input (time zero-padding == Conv1d padding); bf16 for the MXU.
    x_halo = jnp.pad(x, ((0, 0), (pad, pad), (0, 0))).astype(jnp.bfloat16)
    T_halo = T + 2 * pad

    # Conv weight taps: w_packed[k, d, f] = conv_w[f, d, k]; zero-pad F -> F_pad.
    w_packed = jnp.transpose(conv_w, (2, 1, 0))
    w_packed = jnp.pad(w_packed, ((0, 0), (0, 0), (0, F_pad - F))).astype(jnp.bfloat16)
    bconv = jnp.pad(conv_b.reshape(1, F), ((0, 0), (0, F_pad - F))).astype(jnp.float32)

    # fc weight rearranged to (t, f) (PyTorch flatten index is f*T + t), zero-padded
    # in F so padded lanes contribute exactly 0.
    fcw_tf = jnp.transpose(fc_w.reshape(F, T))                 # (T, F)
    fcw = jnp.pad(fcw_tf, ((0, 0), (0, F_pad - F))).astype(jnp.float32)

    TB = _pick_batch_tile(B, T)
    grid = (B // TB,)

    # Rough working-set estimate -> explicit scoped-VMEM limit (v5e default is 16 MiB).
    est = (2 * TB * T_halo * D * 2           # double-buffered bf16 input block
           + 2 * K * D * F_pad * 2           # resident conv weight
           + T * F_pad * 4 + F_pad * 4       # fc weight + conv bias
           + 2 * TB * F_pad * 4              # double-buffered output block
           + 3 * TB * T * F_pad * 4)         # acc / act / scaled temporaries
    vmem_limit = int(min(max(2 * est, 8 * 2 ** 20), 32 * 2 ** 20))

    partial = pl.pallas_call(
        _cnn_fused_kernel,
        out_shape=jax.ShapeDtypeStruct((B, F_pad), jnp.float32),
        grid=grid,
        in_specs=[
            pl.BlockSpec((TB, T_halo, D), lambda b: (b, 0, 0)),   # halo'd input (pipelined)
            pl.BlockSpec((K, D, F_pad), lambda b: (0, 0, 0)),     # conv weight (resident)
            pl.BlockSpec((1, F_pad), lambda b: (0, 0)),           # conv bias   (resident)
            pl.BlockSpec((T, F_pad), lambda b: (0, 0)),           # fc weight   (resident)
        ],
        out_specs=pl.BlockSpec((TB, F_pad), lambda b: (b, 0)),
        compiler_params=pltpu.CompilerParams(
            dimension_semantics=("parallel",),     # megacore-shardable batch axis (v7x)
            vmem_limit_bytes=vmem_limit),
    )(x_halo, w_packed, bconv, fcw)

    # Final lane reduce (B*F_pad -> B) + fc bias: trivially small, done in JAX.
    return jnp.sum(partial, axis=-1, keepdims=True) + fc_b.reshape(1, 1)


# ----------------------------------------------------------------------------
# Pure-JAX f32 reference (independent derivation of the PyTorch semantics)
# ----------------------------------------------------------------------------
def cnn_reference(x, params):
    B, T, D = x.shape
    W = params["conv_w"]                       # (F, D, K)
    F, _, K = W.shape
    pad = (K - 1) // 2
    x_pad = jnp.pad(x, ((0, 0), (pad, pad), (0, 0)))          # (B, T+2p, D)
    conv = sum(jnp.einsum("btd,fd->bft", x_pad[:, k:k + T, :], W[:, :, k])
               for k in range(K)) + params["conv_b"][None, :, None]
    act = jnp.maximum(conv, 0.0)                               # (B, F, T)
    flat = act.reshape(B, -1)                                  # PyTorch order f*T + t
    return flat @ params["fc_w"].T + params["fc_b"]


# ----------------------------------------------------------------------------
# Deterministic parameter construction (PyTorch-style uniform init)
# ----------------------------------------------------------------------------
def make_params(key, input_dim, sequence_length, num_filters=64, kernel_size=3):
    k1, k2, k3, k4 = jax.random.split(key, 4)
    conv_bound = 1.0 / jnp.sqrt(input_dim * kernel_size)
    fc_in = num_filters * sequence_length
    fc_bound = 1.0 / jnp.sqrt(fc_in)
    return dict(
        conv_w=jax.random.uniform(k1, (num_filters, input_dim, kernel_size),
                                  jnp.float32, -conv_bound, conv_bound),
        conv_b=jax.random.uniform(k2, (num_filters,), jnp.float32,
                                  -conv_bound, conv_bound),
        fc_w=jax.random.uniform(k3, (1, fc_in), jnp.float32, -fc_bound, fc_bound),
        fc_b=jax.random.uniform(k4, (1,), jnp.float32, -fc_bound, fc_bound),
    )


# ----------------------------------------------------------------------------
if __name__ == "__main__":
    B, T, D = 2, 8, 16                # batch, sequence_length, input_dim
    NUM_FILTERS, KSIZE = 64, 3

    key = jax.random.PRNGKey(0)
    key, kx = jax.random.split(key)
    x = jax.random.normal(kx, (B, T, D), jnp.float32)
    params = make_params(key, D, T, NUM_FILTERS, KSIZE)

    out = jax.block_until_ready(jax.jit(cnn_forward)(x, params))
    ref = jax.block_until_ready(cnn_reference(x, params))

    assert out.shape == (B, 1), out.shape
    # bf16 MXU inputs -> loosened tolerance vs the f32 reference.
    assert jnp.allclose(out, ref, rtol=2e-2, atol=2e-2), (out, ref)

    print("KERNEL_OK")
</pallas_src>

<mosaic_0001>
module attributes {stable_mosaic.version = 11 : i64} {
  func.func @_cnn_fused_kernel(%arg0: i32, %arg1: memref<2x10x16xbf16, #tpu.memory_space<vmem>>, %arg2: memref<3x16x128xbf16, #tpu.memory_space<vmem>>, %arg3: memref<1x128xf32, #tpu.memory_space<vmem>>, %arg4: memref<8x128xf32, #tpu.memory_space<vmem>>, %arg5: memref<2x128xf32, #tpu.memory_space<vmem>>) attributes {dimension_semantics = [#tpu.dimension_semantics<parallel>], iteration_bounds = array<i64: 1>, scalar_prefetch = 0 : i64, scratch_operands = 0 : i64, tpu.core_type = #tpu.core_type<tc>, window_params = [{transform_indices = @transform_0, window_bounds = array<i64: 2, 10, 16>}, {pipeline_mode = #tpu.pipeline_mode<synchronous>, transform_indices = @transform_1, window_bounds = array<i64: 3, 16, 128>}, {pipeline_mode = #tpu.pipeline_mode<synchronous>, transform_indices = @transform_2, window_bounds = array<i64: 1, 128>}, {pipeline_mode = #tpu.pipeline_mode<synchronous>, transform_indices = @transform_3, window_bounds = array<i64: 8, 128>}, {transform_indices = @transform_4, window_bounds = array<i64: 2, 128>}]} {
    %c0 = arith.constant 0 : index
    %c0_0 = arith.constant 0 : index
    %c0_1 = arith.constant 0 : index
    %0 = vector.load %arg1[%c0, %c0_0, %c0_1] : memref<2x10x16xbf16, #tpu.memory_space<vmem>>, vector<2x10x16xbf16>
    %1 = vector.extract_strided_slice %0 {offsets = [0, 0, 0], sizes = [2, 8, 16], strides = [1, 1, 1]} : vector<2x10x16xbf16> to vector<2x8x16xbf16>
    %2 = vector.shape_cast %1 : vector<2x8x16xbf16> to vector<16x16xbf16>
    %c0_2 = arith.constant 0 : index
    %c0_3 = arith.constant 0 : index
    %c0_4 = arith.constant 0 : index
    %3 = vector.load %arg2[%c0_2, %c0_3, %c0_4] : memref<3x16x128xbf16, #tpu.memory_space<vmem>>, vector<1x16x128xbf16>
    %4 = vector.shape_cast %3 : vector<1x16x128xbf16> to vector<16x128xbf16>
    %cst = arith.constant dense<0.000000e+00> : vector<16x128xf32>
    %5 = tpu.matmul %2, %4, %cst {dimension_numbers = #tpu.dot_dimension_numbers<[1], [0], [0], [1], [0, 0, 1, 1], [], []>} : vector<16x16xbf16>, vector<16x128xbf16>, vector<16x128xf32> -> vector<16x128xf32>
    %6 = vector.extract_strided_slice %0 {offsets = [0, 1, 0], sizes = [2, 8, 16], strides = [1, 1, 1]} : vector<2x10x16xbf16> to vector<2x8x16xbf16>
    %7 = vector.shape_cast %6 : vector<2x8x16xbf16> to vector<16x16xbf16>
    %c1 = arith.constant 1 : index
    %c0_5 = arith.constant 0 : index
    %c0_6 = arith.constant 0 : index
    %8 = vector.load %arg2[%c1, %c0_5, %c0_6] : memref<3x16x128xbf16, #tpu.memory_space<vmem>>, vector<1x16x128xbf16>
    %9 = vector.shape_cast %8 : vector<1x16x128xbf16> to vector<16x128xbf16>
    %cst_7 = arith.constant dense<0.000000e+00> : vector<16x128xf32>
    %10 = tpu.matmul %7, %9, %cst_7 {dimension_numbers = #tpu.dot_dimension_numbers<[1], [0], [0], [1], [0, 0, 1, 1], [], []>} : vector<16x16xbf16>, vector<16x128xbf16>, vector<16x128xf32> -> vector<16x128xf32>
    %11 = arith.addf %5, %10 : vector<16x128xf32>
    %12 = vector.extract_strided_slice %0 {offsets = [0, 2, 0], sizes = [2, 8, 16], strides = [1, 1, 1]} : vector<2x10x16xbf16> to vector<2x8x16xbf16>
    %13 = vector.shape_cast %12 : vector<2x8x16xbf16> to vector<16x16xbf16>
    %c2 = arith.constant 2 : index
    %c0_8 = arith.constant 0 : index
    %c0_9 = arith.constant 0 : index
    %14 = vector.load %arg2[%c2, %c0_8, %c0_9] : memref<3x16x128xbf16, #tpu.memory_space<vmem>>, vector<1x16x128xbf16>
    %15 = vector.shape_cast %14 : vector<1x16x128xbf16> to vector<16x128xbf16>
    %cst_10 = arith.constant dense<0.000000e+00> : vector<16x128xf32>
    %16 = tpu.matmul %13, %15, %cst_10 {dimension_numbers = #tpu.dot_dimension_numbers<[1], [0], [0], [1], [0, 0, 1, 1], [], []>} : vector<16x16xbf16>, vector<16x128xbf16>, vector<16x128xf32> -> vector<16x128xf32>
    %17 = arith.addf %11, %16 : vector<16x128xf32>
    %c0_11 = arith.constant 0 : index
    %c0_12 = arith.constant 0 : index
    %18 = vector.load %arg3[%c0_11, %c0_12] : memref<1x128xf32, #tpu.memory_space<vmem>>, vector<1x128xf32>
    %19 = vector.broadcast %18 : vector<1x128xf32> to vector<16x128xf32>
    %20 = arith.addf %17, %19 : vector<16x128xf32>
    %cst_13 = arith.constant 0.000000e+00 : f32
    %21 = vector.broadcast %cst_13 : f32 to vector<16x128xf32>
    %22 = arith.maximumf %20, %21 : vector<16x128xf32>
    %23 = vector.shape_cast %22 : vector<16x128xf32> to vector<2x8x128xf32>
    %c0_14 = arith.constant 0 : index
    %c0_15 = arith.constant 0 : index
    %24 = vector.load %arg4[%c0_14, %c0_15] : memref<8x128xf32, #tpu.memory_space<vmem>>, vector<8x128xf32>
    %25 = vector.shape_cast %24 : vector<8x128xf32> to vector<1x8x128xf32>
    %26 = vector.broadcast %25 : vector<1x8x128xf32> to vector<2x8x128xf32>
    %27 = arith.mulf %23, %26 : vector<2x8x128xf32>
    %cst_16 = arith.constant dense<0.000000e+00> : vector<2x128xf32>
    %28 = vector.multi_reduction <add>, %27, %cst_16 [1] : vector<2x8x128xf32> to vector<2x128xf32>
    %c0_17 = arith.constant 0 : index
    %c0_18 = arith.constant 0 : index
    %29 = vector.load %arg5[%c0_17, %c0_18] : memref<2x128xf32, #tpu.memory_space<vmem>>, vector<2x128xf32>
    tpu.vector_store %arg5[%c0_17, %c0_18], %28 {strides = array<i32>} : memref<2x128xf32, #tpu.memory_space<vmem>>, vector<2x128xf32>,
    return
  }
  func.func @transform_0(%arg0: i32) -> (i32, i32, i32) {
    %c0_i32 = arith.constant 0 : i32
    %c0_i32_0 = arith.constant 0 : i32
    %c0_i32_1 = arith.constant 0 : i32
    return %arg0, %c0_i32, %c0_i32_0 : i32, i32, i32
  }
  func.func @transform_1(%arg0: i32) -> (i32, i32, i32) {
    %c0_i32 = arith.constant 0 : i32
    %c0_i32_0 = arith.constant 0 : i32
    %c0_i32_1 = arith.constant 0 : i32
    %c0_i32_2 = arith.constant 0 : i32
    return %c0_i32, %c0_i32_0, %c0_i32_1 : i32, i32, i32
  }
  func.func @transform_2(%arg0: i32) -> (i32, i32) {
    %c0_i32 = arith.constant 0 : i32
    %c0_i32_0 = arith.constant 0 : i32
    %c0_i32_1 = arith.constant 0 : i32
    return %c0_i32, %c0_i32_0 : i32, i32
  }
  func.func @transform_3(%arg0: i32) -> (i32, i32) {
    %c0_i32 = arith.constant 0 : i32
    %c0_i32_0 = arith.constant 0 : i32
    %c0_i32_1 = arith.constant 0 : i32
    return %c0_i32, %c0_i32_0 : i32, i32
  }
  func.func @transform_4(%arg0: i32) -> (i32, i32) {
    %c0_i32 = arith.constant 0 : i32
    %c0_i32_0 = arith.constant 0 : i32
    return %arg0, %c0_i32 : i32, i32
  }
}

</mosaic_0001>

<bundles_post_ra>
// kernel: cnn_forward.1
= control target key start
LH: loop header
LB: loop body
LE: loop exit
PB: predicated region body
PF: predicated region fallthrough
CT: control target
= control target key end

     0   :  { %vm24_vm0 = vsmask.f32 3328  ;;  %v320_v0 = vmov 0.0   ;;  %vm321_vm1 = vmmov 0   ;;  %vm25_vm2 = vsmask.f32 7440  ;;  %s384_s1 = inlined_call_operand.vmem [shape: bf16[3,16,128], index: 1, kind: input, shape index: {}]   ;;  %s385_s0 = inlined_call_operand.vmem [shape: bf16[2,10,16], index: 0, kind: input, shape index: {}]   ;;  %s386_s2 = inlined_call_operand.vmem [shape: f32[1,128], index: 2, kind: input, shape index: {}]   ;;  %s387_s3 = inlined_call_operand.vmem [shape: f32[8,128], index: 3, kind: input, shape index: {}]   ;;  %s388_s4 = inlined_call_operand.vmem [shape: f32[2,128], index: 4, kind: output, shape index: {}]  }
   0x1   :  { %296 = vmatprep.subr.bf16.mxu0 %v320_v0  ;;  %v316_v1 = vld [vmem:[%s384_s1 + $0x8] sm:$0xff]   ;;  %302 = vmatprep.subr.bf16.mxu1 %v320_v0  ;;  %v317_v2 = vld [vmem:[%s384_s1] sm:$0xff]   ;;  %vm67_vm3 = vcmask 130048   ;;  %vm26_vm4 = vmor %vm24_vm0, %vm25_vm2  ;;  %vm169_vm5 = vcmask 1042432   ;;  %vm170_vm6 = vcmask 1046532   ;;  %vm266_vm8 = vcmask 1041409  }
   0x2   :  { %298 = vmatprep.mubr.msk.bf16.mxu0 %vm321_vm1, %v320_v0  ;;  %304 = vmatprep.mubr.msk.bf16.mxu1 %vm321_vm1, %v320_v0  ;;  %v18_v3 = vld [vmem:[%s385_s0] sm:$0xf]  ;;  %v19_v4 = vld [vmem:[%s385_s0 + $0x4] sm:$0x1]  ;;  %v20_v5 = vld [vmem:[%s385_s0 + $0x8] sm:$0xf] }
   0x3   :  { %297 = vmatpush3.bf16.msra.mxu0 %v316_v1  ;;  %303 = vmatpush3.bf16.msra.mxu1 %v317_v2  ;;  %v21_v6 = vld [vmem:[%s385_s0 + $0xc] sm:$0x1]  ;;  %v28_v7 = vshrl.u32 %v18_v3, 16  ;;  %v31_v8 = vshll.u32 %v18_v3, 16  ;;  %v37_v9 = vshll.u32 %v19_v4, 16  ;;  %v42_v10 = vshrl.u32 %v20_v5, 16  ;;  %vm171_vm7 = vmor %vm169_vm5, %vm170_vm6 }
   0x4   :  { %308 = vmatprep.subr.bf16.mxu0 %v320_v0  ;;  %v45_v11 = vshll.u32 %v20_v5, 16  ;;  %v51_v12 = vshll.u32 %v21_v6, 16  ;;  %v279_v17 = vcombine.low %v18_v3, %v20_v5  ;;  %v174_v25 = vrot.slane %v19_v4, 5  ;;  %v319_v28 = vld [vmem:[%s384_s1 + $0x10] sm:$0xff]   ;;  %v289_v45 = vld [vmem:[%s386_s2] ss:$0 sm:$0xff] }
   0x5   :  { %v30_v13 = vrot.slane %v28_v7, 4  ;;  %v33_v14 = vrot.slane %v31_v8, 5  ;;  %v44_v15 = vrot.slane %v42_v10, 4  ;;  %v39_v19 = vrot.slane %v37_v9, 5  ;;  %v249_v50 = vld [vmem:[%s387_s3] sm:$0xff] }
   0x6   :  { %v47_v16 = vrot.slane %v45_v11, 5  ;;  %v53_v21 = vrot.slane %v51_v12, 5  ;;  %305 = vmatmul.mubr.msk.bf16.vlgmr.msra.gmra.mxu1 %vm67_vm3, %v279_v17  ;;  %v178_v27 = vrot.slane %v21_v6, 5  ;;  %v282_v29 = vrot.slane %v18_v3, 9 }
   0x7   :  { %v34_v18 = vor.u32 %v33_v14, %v30_v13  ;;  %v283_v30 = vrot.slane %v20_v5, 9 }
   0x8   :  { %v48_v20 = vor.u32 %v47_v16, %v44_v15  ;;  %v175_v32 = vsel %vm171_vm7, %v282_v29, %v174_v25 }
   0x9   :  { %v35_v22 = vrot.slane %v34_v18, 4  ;;  %v179_v33 = vsel %vm171_vm7, %v283_v30, %v178_v27 }
   0xa   :  { %v49_v23 = vrot.slane %v48_v20, 4  ;;  %v286_v34 = vcombine.low %v175_v32, %v179_v33 }
   0xb   :  { %v40_v24 = vsel %vm26_vm4, %v35_v22, %v39_v19 }
   0xc   :  { %v54_v26 = vsel %vm26_vm4, %v49_v23, %v53_v21 }
   0xd   :  { %v276_v31 = vcombine.low %v40_v24, %v54_v26 }
   0xf   :  { %299 = vmatmul.mubr.msk.bf16.vlgmr.msra.gmra.mxu0 %vm67_vm3, %v276_v31 }
  0x10   :  { %309 = vmatpush3.bf16.msra.mxu0 %v319_v28  ;;  %310 = vmatprep.mubr.msk.bf16.mxu0 %vm321_vm1, %v320_v0 }
  0x17   :  { %311 = vmatmul.mubr.msk.bf16.vlgmr.msra.gmra.mxu0 %vm67_vm3, %v286_v34 }
  0xc6   :  { %v160_v35 = vpop.f32.mrf.mxu1 }
  0xc8   :  { %v306_v36 = vpop.f32.mrf.mxu1 }
  0xca   :  { %v163_v37 = vpop.f32.mrf.mxu1 }
  0xcc   :  { %v307_v38 = vpop.f32.mrf.mxu1 }
  0xcf   :  { %v105_v39 = vpop.f32.mrf.mxu0 }
  0xd0   :  { %v161_v43 = vadd.f32 %v160_v35, %v105_v39 }
  0xd1   :  { %v300_v40 = vpop.f32.mrf.mxu0 }
  0xd3   :  { %v108_v41 = vpop.f32.mrf.mxu0 }
  0xd4   :  { %v164_v48 = vadd.f32 %v163_v37, %v108_v41 }
  0xd5   :  { %v301_v42 = vpop.f32.mrf.mxu0 }
  0xd7   :  { %v229_v44 = vpop.f32.mrf.mxu0 }
  0xd8   :  { %v236_v46 = vadd.f32 %v229_v44, %v161_v43 }
  0xd9   :  { %v312_v47 = vpop.f32.mrf.mxu0 }
  0xda   :  { %v245_v49 = vadd.f32 %v289_v45, %v236_v46 }
  0xdb   :  { %v232_v51 = vpop.f32.mrf.mxu0 }
  0xdc   :  { %v247_v52 = vmax.f32 %v245_v49, 0.0  ;;  %v237_v53 = vadd.f32 %v232_v51, %v164_v48 }
  0xdd   :  { %v313_v54 = vpop.f32.mrf.mxu0 }
  0xde   :  { %v250_v55 = vmul.f32 %v249_v50, %v247_v52  ;;  %v246_v56 = vadd.f32 %v289_v45, %v237_v53 }
  0xe0   :  { %v252_v57 = vrot.slane %v250_v55, 4  ;;  %v248_v58 = vmax.f32 %v246_v56, 0.0 }
  0xe2   :  { %v253_v59 = vadd.f32 %v252_v57, %v250_v55  ;;  %v251_v60 = vmul.f32 %v249_v50, %v248_v58 }
  0xe4   :  { %v254_v61 = vrot.slane %v253_v59, 2  ;;  %v258_v62 = vrot.slane %v251_v60, 4 }
  0xe6   :  { %v255_v63 = vadd.f32 %v254_v61, %v253_v59  ;;  %v259_v0 = vadd.f32 %v258_v62, %v251_v60 }
  0xe8   :  { %v260_v1 = vrot.slane %v259_v0, 2  ;;  %v256_v2 = vrot.slane %v255_v63, 1 }
  0xea   :  { %v261_v3 = vadd.f32 %v260_v1, %v259_v0  ;;  %v257_v5 = vadd.f32 %v256_v2, %v255_v63 }
  0xec   :  { %v262_v4 = vrot.slane %v261_v3, 1 }
  0xee   :  { %v263_v6 = vadd.f32 %v262_v4, %v261_v3 }
  0xf0   :  { %v267_v7 = vsel %vm266_vm8, %v263_v6, %v257_v5 }
  0xf1   :  { %269 = vst [vmem:[%s388_s4] sm:$0x3] %v267_v7 }

</bundles_post_ra>
